<compile_context>
chip_gen: v7x
topology: tpu7x:2x2x1
jax: 0.10.0
libtpu: 0.0.40
codegen_flags: <defaults>
</compile_context>

<pallas_src>
import functools

import jax
import jax.numpy as jnp
from jax.experimental import pallas as pl
from jax.experimental.pallas import tpu as pltpu


def _skip_mlp_kernel(x_ref, w1_ref, b1_ref, w2_ref, b2_ref, o_ref):
    """One batch tile: out = relu(x @ W1 + b1) @ W2 + b2 + x (weights pre-transposed)."""
    x_f32 = x_ref[...]                               # f32, kept for residual + epilogue
    x_bf16 = x_f32.astype(jnp.bfloat16)              # bf16 only into the MXU

    # Layer 1: bf16 matmul, f32 accumulate; f32 bias + ReLU epilogue (v5e VPU has no bf16).
    h = jnp.dot(x_bf16, w1_ref[...], preferred_element_type=jnp.float32)
    h = jnp.maximum(h + b1_ref[...], 0.0)

    # Layer 2: bf16 matmul, f32 accumulate; f32 bias + residual add, then output cast.
    y = jnp.dot(h.astype(jnp.bfloat16), w2_ref[...], preferred_element_type=jnp.float32)
    o_ref[...] = (y + b2_ref[...] + x_f32).astype(o_ref.dtype)


def prepare_params(w1, b1, w2, b2):
    """One-time parameter prep (hoisted out of the per-call hot path).

    In: PyTorch Linear convention, weight [out, in], bias [out].
    Out: weights transposed to [in, out] and cast to bf16; biases as f32 [1, out].
    """
    w1_t = jnp.asarray(w1, jnp.float32).T.astype(jnp.bfloat16)
    w2_t = jnp.asarray(w2, jnp.float32).T.astype(jnp.bfloat16)
    b1_r = jnp.asarray(b1, jnp.float32).reshape(1, -1)
    b2_r = jnp.asarray(b2, jnp.float32).reshape(1, -1)
    return w1_t, b1_r, w2_t, b2_r


@functools.partial(jax.jit, static_argnames=("tile_b",))
def skip_connection_forward(x, w1_t, b1_r, w2_t, b2_r, *, tile_b=128):
    """x: [B, H] f32; w1_t/w2_t: [H, H] bf16 (pre-transposed); b1_r/b2_r: [1, H] f32."""
    B, H = x.shape
    tile_b = min(tile_b, B)
    if B % tile_b:
        raise ValueError(f"B={B} must be a multiple of tile_b={tile_b}")

    grid = (B // tile_b,)
    return pl.pallas_call(
        _skip_mlp_kernel,
        out_shape=jax.ShapeDtypeStruct((B, H), x.dtype),
        grid_spec=pltpu.PrefetchScalarGridSpec(
            num_scalar_prefetch=0,
            grid=grid,
            in_specs=[
                pl.BlockSpec((tile_b, H), lambda i: (i, 0)),  # x tile (streamed)
                # Resident parameters: constant index_map, DMA'd once and reused
                # across every batch tile (revisited block => no re-fetch).
                # TODO(synk): tile the hidden/K axis when H grows large enough
                # that the resident bf16 weights pressure VMEM (v7x: 64 MiB);
                # at H=128 both weights together are only ~64 KiB.
                pl.BlockSpec((H, H), lambda i: (0, 0)),       # W1^T (bf16, resident)
                pl.BlockSpec((1, H), lambda i: (0, 0)),       # b1   (f32)
                pl.BlockSpec((H, H), lambda i: (0, 0)),       # W2^T (bf16, resident)
                pl.BlockSpec((1, H), lambda i: (0, 0)),       # b2   (f32)
            ],
            out_specs=pl.BlockSpec((tile_b, H), lambda i: (i, 0)),
        ),
        # Each x tile is fully read before its (identically-indexed) output tile is
        # written, so aliasing the residual input to the output is safe.
        input_output_aliases={0: 0},
        compiler_params=pltpu.CompilerParams(
            dimension_semantics=("parallel",),        # batch axis shards across v7x TCs
            vmem_limit_bytes=48 * 1024 * 1024,        # headroom; below v7x 64 MiB physical
        ),
    )(x, w1_t, b1_r, w2_t, b2_r)


def _reference(x, w1, b1, w2, b2):
    h = jnp.maximum(x @ w1.T + b1, 0.0)
    return h @ w2.T + b2 + x


if __name__ == "__main__":
    # Small, tile-aligned shapes: H=128 keeps the lane dim full (unmasked stores),
    # B=256 with tile_b=128 gives 2 grid steps so the parallel batch axis still
    # feeds both v7x TensorCores, with [128,128]x[128,128] MXU matmuls per tile.
    B, H = 256, 128
    TILE_B = 128

    key = jax.random.PRNGKey(0)
    kx, k1, k2, k3, k4 = jax.random.split(key, 5)

    # PyTorch Linear shapes: weight [out, in], bias [out].
    x = jax.random.normal(kx, (B, H), dtype=jnp.float32)
    w1 = jax.random.normal(k1, (H, H), dtype=jnp.float32) * 0.05
    b1 = jax.random.normal(k2, (H,), dtype=jnp.float32) * 0.05
    w2 = jax.random.normal(k3, (H, H), dtype=jnp.float32) * 0.05
    b2 = jax.random.normal(k4, (H,), dtype=jnp.float32) * 0.05

    params = prepare_params(w1, b1, w2, b2)           # one-time transpose + bf16 cast
    out = skip_connection_forward(x, *params, tile_b=TILE_B)
    out = jax.block_until_ready(out)

    ref = _reference(x, w1, b1, w2, b2)               # f32 reference
    assert out.shape == x.shape and out.dtype == x.dtype
    # bf16 MXU operands with f32 accumulation: tolerance loosened vs the f32 reference.
    assert jnp.allclose(out, ref, atol=3e-2, rtol=2e-2), "mismatch vs reference"

    print("KERNEL_OK")
</pallas_src>

<mosaic_0001>
module attributes {stable_mosaic.version = 11 : i64} {
  func.func @_skip_mlp_kernel(%arg0: i32, %arg1: memref<128x128xf32, #tpu.memory_space<vmem>>, %arg2: memref<128x128xbf16, #tpu.memory_space<vmem>>, %arg3: memref<1x128xf32, #tpu.memory_space<vmem>>, %arg4: memref<128x128xbf16, #tpu.memory_space<vmem>>, %arg5: memref<1x128xf32, #tpu.memory_space<vmem>>, %arg6: memref<128x128xf32, #tpu.memory_space<vmem>>) attributes {dimension_semantics = [#tpu.dimension_semantics<parallel>], iteration_bounds = array<i64: 2>, scalar_prefetch = 0 : i64, scratch_operands = 0 : i64, tpu.core_type = #tpu.core_type<tc>, window_params = [{transform_indices = @transform_0, window_bounds = array<i64: 128, 128>}, {pipeline_mode = #tpu.pipeline_mode<synchronous>, transform_indices = @transform_1, window_bounds = array<i64: 128, 128>}, {pipeline_mode = #tpu.pipeline_mode<synchronous>, transform_indices = @transform_2, window_bounds = array<i64: 1, 128>}, {pipeline_mode = #tpu.pipeline_mode<synchronous>, transform_indices = @transform_3, window_bounds = array<i64: 128, 128>}, {pipeline_mode = #tpu.pipeline_mode<synchronous>, transform_indices = @transform_4, window_bounds = array<i64: 1, 128>}, {transform_indices = @transform_5, window_bounds = array<i64: 128, 128>}]} {
    %c0 = arith.constant 0 : index
    %c0_0 = arith.constant 0 : index
    %0 = vector.load %arg1[%c0, %c0_0] : memref<128x128xf32, #tpu.memory_space<vmem>>, vector<128x128xf32>
    %1 = arith.truncf %0 : vector<128x128xf32> to vector<128x128xbf16>
    %c0_1 = arith.constant 0 : index
    %c0_2 = arith.constant 0 : index
    %2 = vector.load %arg2[%c0_1, %c0_2] : memref<128x128xbf16, #tpu.memory_space<vmem>>, vector<128x128xbf16>
    %cst = arith.constant dense<0.000000e+00> : vector<128x128xf32>
    %3 = tpu.matmul %1, %2, %cst {dimension_numbers = #tpu.dot_dimension_numbers<[1], [0], [0], [1], [0, 0, 1, 1], [], []>} : vector<128x128xbf16>, vector<128x128xbf16>, vector<128x128xf32> -> vector<128x128xf32>
    %c0_3 = arith.constant 0 : index
    %c0_4 = arith.constant 0 : index
    %4 = vector.load %arg3[%c0_3, %c0_4] : memref<1x128xf32, #tpu.memory_space<vmem>>, vector<1x128xf32>
    %5 = vector.broadcast %4 : vector<1x128xf32> to vector<128x128xf32>
    %6 = arith.addf %3, %5 : vector<128x128xf32>
    %cst_5 = arith.constant 0.000000e+00 : f32
    %7 = vector.broadcast %cst_5 : f32 to vector<128x128xf32>
    %8 = arith.maximumf %6, %7 : vector<128x128xf32>
    %9 = arith.truncf %8 : vector<128x128xf32> to vector<128x128xbf16>
    %c0_6 = arith.constant 0 : index
    %c0_7 = arith.constant 0 : index
    %10 = vector.load %arg4[%c0_6, %c0_7] : memref<128x128xbf16, #tpu.memory_space<vmem>>, vector<128x128xbf16>
    %cst_8 = arith.constant dense<0.000000e+00> : vector<128x128xf32>
    %11 = tpu.matmul %9, %10, %cst_8 {dimension_numbers = #tpu.dot_dimension_numbers<[1], [0], [0], [1], [0, 0, 1, 1], [], []>} : vector<128x128xbf16>, vector<128x128xbf16>, vector<128x128xf32> -> vector<128x128xf32>
    %c0_9 = arith.constant 0 : index
    %c0_10 = arith.constant 0 : index
    %12 = vector.load %arg5[%c0_9, %c0_10] : memref<1x128xf32, #tpu.memory_space<vmem>>, vector<1x128xf32>
    %13 = vector.broadcast %12 : vector<1x128xf32> to vector<128x128xf32>
    %14 = arith.addf %11, %13 : vector<128x128xf32>
    %15 = arith.addf %14, %0 : vector<128x128xf32>
    %c0_11 = arith.constant 0 : index
    %c0_12 = arith.constant 0 : index
    %16 = vector.load %arg6[%c0_11, %c0_12] : memref<128x128xf32, #tpu.memory_space<vmem>>, vector<128x128xf32>
    tpu.vector_store %arg6[%c0_11, %c0_12], %15 {strides = array<i32>} : memref<128x128xf32, #tpu.memory_space<vmem>>, vector<128x128xf32>,
    return
  }
  func.func @transform_0(%arg0: i32) -> (i32, i32) {
    %c0_i32 = arith.constant 0 : i32
    %c0_i32_0 = arith.constant 0 : i32
    return %arg0, %c0_i32 : i32, i32
  }
  func.func @transform_1(%arg0: i32) -> (i32, i32) {
    %c0_i32 = arith.constant 0 : i32
    %c0_i32_0 = arith.constant 0 : i32
    %c0_i32_1 = arith.constant 0 : i32
    return %c0_i32, %c0_i32_0 : i32, i32
  }
  func.func @transform_2(%arg0: i32) -> (i32, i32) {
    %c0_i32 = arith.constant 0 : i32
    %c0_i32_0 = arith.constant 0 : i32
    %c0_i32_1 = arith.constant 0 : i32
    return %c0_i32, %c0_i32_0 : i32, i32
  }
  func.func @transform_3(%arg0: i32) -> (i32, i32) {
    %c0_i32 = arith.constant 0 : i32
    %c0_i32_0 = arith.constant 0 : i32
    %c0_i32_1 = arith.constant 0 : i32
    return %c0_i32, %c0_i32_0 : i32, i32
  }
  func.func @transform_4(%arg0: i32) -> (i32, i32) {
    %c0_i32 = arith.constant 0 : i32
    %c0_i32_0 = arith.constant 0 : i32
    %c0_i32_1 = arith.constant 0 : i32
    return %c0_i32, %c0_i32_0 : i32, i32
  }
  func.func @transform_5(%arg0: i32) -> (i32, i32) {
    %c0_i32 = arith.constant 0 : i32
    %c0_i32_0 = arith.constant 0 : i32
    return %arg0, %c0_i32 : i32, i32
  }
}

</mosaic_0001>

<bundles_post_ra>
// kernel: skip_connection_forward.1
= control target key start
LH: loop header
LB: loop body
LE: loop exit
PB: predicated region body
PF: predicated region fallthrough
CT: control target
= control target key end

     0   :  { %10 = vsyncpa [#allocation3], 0  ;;  %s1400_s0 = inlined_call_operand.hbm [shape: f32[256,128], index: 0, kind: input, shape index: {}, may-alias: {0,5}]   ;;  %s1401_s1 = inlined_call_operand.vmem [shape: bf16[128,128], index: 1, kind: input, shape index: {}]   ;;  %s1402_s2 = inlined_call_operand.vmem [shape: f32[1,128], index: 2, kind: input, shape index: {}]   ;;  %s1403_s3 = inlined_call_operand.vmem [shape: bf16[128,128], index: 3, kind: input, shape index: {}]   ;;  %s1404_s4 = inlined_call_operand.vmem [shape: f32[1,128], index: 4, kind: input, shape index: {}]   ;;  %s1405_s5 = inlined_call_operand.hbm [shape: f32[256,128], index: 5, kind: output, shape index: {}, may-alias: {0,5}]  }
   0x1   :  { %12 = vsyncpa [#allocation3 + $0x1], 0 }
   0x2   :  { %13 = vsyncpa [#allocation4], 0 }
   0x3   :  { %15 = vsyncpa [#allocation4 + $0x1], 0  ;;  %s1079_s18 = smov 0   ;;  %s1081_s19 = smov 0  }
   0x4   :  { %s1083_s20 = smov 0   ;;  %s1085_s21 = smov 0  }
   0x5 LB: > { %s1100_s22 = sadd.s32 4294967295, %s1041_s21   ;;  %s749_s23 = sadd.s32 4294967294, %s1041_s21   ;;  %s1041_s21 = sphi %s1085_s21, %s1418_s21   ;;  %s1037_s20 = sphi %s1083_s20, %s1417_s20   ;;  %s1033_s19 = sphi %s1081_s19, %s1416_s19   ;;  %s1029_s18 = sphi %s1079_s18, %s1415_s18  }
   0x6   : > { %s1104_s24 = sadd.s32 1, %s1041_s21   ;;  %s28_s25 = sadd.s32 1, %s1037_s20 }
   0x7   : > { %s25_s26 = ssub.s32 %s1041_s21, %s1104_s24  ;;  %p35_p0 = scmp.ne.s32.totalorder %s1037_s20, %s1033_s19 }
   0x8   : > { %p26_p1 = scmp.eq.s32.totalorder %s25_s26, 0  ;;  %p36_p2 = scmp.eq.s32.totalorder %s1041_s21, 0 }
   0x9   : > { %p41_p3 = scmp.ne.s32.totalorder %s1033_s19, %s1029_s18  ;;  %p42_p4 = scmp.eq.s32.totalorder %s1100_s22, 0 }
   0xa   : > { %s1116_s27 = scalar_select %p26_p1, %s1037_s20, %s28_s25  }
   0xb   : > { %p1118_p5 = por %p36_p2, %p35_p0  ;;  %p1122_p6 = por %p42_p4, %p41_p3 }
   0xc   : > { %p149_p7 = scmp.eq.s32.totalorder %s1100_s22, 1  ;;  %p155_p8 = scmp.eq.s32.totalorder %s749_s23, 1 }
   0xd   : > { %p891_p10 = scmp.lt.s32.totalorder %s1041_s21, 2  ;;  %s187_s7 = sand.u32 1, %s1037_s20  }
   0xe   : > { %p1129_p11 = por %p149_p7, %p35_p0  ;;  %p1133_p12 = por %p155_p8, %p41_p3 }
   0xf   : > { %s781_s8 = sshll.u32 %s1041_s21, 11  ;;  %s752_s9 = sshll.u32 %s187_s7, 7 }
  0x10   : > { %s1409_s30 = scalar_select %p1129_p11, 1, 0 }
  0x11   : > { %s1410_s6 = scalar_select %p1133_p12, 1, 0 }
  0x12   : > { %s1142_s12 = scalar_lea.hbm %s1400_s0, %s781_s8  ;;  %s191_s13 = scalar_lea.vmem [#allocation2], %s752_s9 }
  0x13   : > { %s198_s14 = sshll.u32 %s191_s13, 4  ;;  %p1146_p13 = pnand %p891_p10, %p1118_p5  ;;  %s1150_s14 = int_to_ptr.vmem [resolvable:$true] %s198_s14 }
  0x14   : > { %s1152_s16 = scalar_lea.sflag [#allocation3], %s187_s7  ;;  %s945_s17 = scalar_lea.hbm %s1142_s12, 2048 }
  0x15   : > { %p946_p0 = scmp.ne.s32.totalorder %s1142_s12, %s945_s17  ;;  %p947_p1 = pneg %p1146_p13 }
  0x16   : > { %s950_s26 = scalar_lea.hbm %s1400_s0, 4096  ;;  %p951_p4 = scmp.lt.u32.totalorder %s1142_s12, %s1400_s0 }
  0x17   : > { %p948_p2 = pnand %p947_p1, %p946_p0  ;;  %p952_p5 = scmp.lt.u32.totalorder %s950_s26, %s945_s17 }
  0x18   : > { %p954_p8 = scmp.lt.u32.totalorder %s945_s17, %s1142_s12 }
  0x19   : > { %p949_p3 = pneg %p948_p2  ;;  %p953_p7 = por %p952_p5, %p951_p4 }
  0x1b   : > { %p955_p10 = por %p954_p8, %p953_p7 }
  0x1d   : > { %p956_p9 = pnand %p955_p10, %p949_p3 }
  0x1f   : > { %959 = shalt.err (!%p956_p9)
}
  0x20   : > { %s960_s7 = scalar_lea.vmem %s1150_s14, 2048  ;;  %s1043_s9 = smov [#allocation2]  }
  0x21   : > { %p961_p0 = scmp.ne.s32.totalorder %s1150_s14, %s960_s7  ;;  %s965_s10 = sshll.u32 %s1043_s9, 4  ;;  %s966_s10 = int_to_ptr.vmem [resolvable:$false] %s965_s10 }
  0x22   : > { %s967_s11 = scalar_lea.vmem %s966_s10, 4096  ;;  %p968_p11 = scmp.lt.s32.totalorder %s1150_s14, %s966_s10 }
  0x23   : > { %p963_p2 = pnand %p961_p0, %p947_p1  ;;  %p969_p4 = scmp.lt.s32.totalorder %s967_s11, %s960_s7 }
  0x25   : > { %p964_p12 = pneg %p963_p2  ;;  %p970_p5 = por %p969_p4, %p968_p11 }
  0x27   : > { %p971_p7 = pnand %p970_p5, %p964_p12 }
  0x29   : > { %974 = shalt.err (!%p971_p7)
}
  0x2a   : > { %s1044_s13 = smov 128   ;;  %s1045_s17 = smov 8  }
  0x2b   : > { %886 = dma.hbm_to_vmem [thread:$0]  (!%p1146_p13), %s1142_s12, 2048, %s1150_s14, %s1152_s16, %s1044_s13, %s1044_s13, %s1045_s17  }
  0x2c   : > { %p755_p9 = scmp.ge.s32.totalorder %s1041_s21, 1  ;;  %p206_p1 = scmp.lt.s32.totalorder %s1041_s21, 3 }
  0x2e   : > { %p207_p3 = pnand %p755_p9, %p206_p1 }
  0x2f   : > { %s1183_s23 = sand.u32 (!%p207_p3), 1, %s1033_s19  }
  0x30   : > { %210 = sbr.rel (%p207_p3) target bundleno = 569 (0x239), region = 40  ;;  %s756_s25 = sshll.u32 (!%p207_p3), %s1183_s23, 7 }
  0x31   : > { %s213_s26 = scalar_lea.sflag (!%p207_p3), [#allocation3], %s1183_s23  ;;  %s1189_s28 = scalar_lea.vmem (!%p207_p3), [#allocation2], %s756_s25 }
  0x37   : > { %1020 = dma.done.wait (%p1122_p6), %s213_s26, 2048  }
  0x38   : > { %1022 = vsyncadd (%p1122_p6), %s213_s26, 4294965248  ;;  %v929_v0 = vld [vmem:[%s1401_s1] sm:$0xff]   ;;  %v930_v1 = vld [vmem:[%s1401_s1 + $0x8] sm:$0xff]   ;;  %s1317_s11 = scalar_lea.vmem [#allocation5], %s756_s25  ;;  %s782_s25 = sshll.u32 %s1100_s22, 11 }
  0x39   : > { %815 = vmatprep.subr.bf16.mxu0 %v929_v0  ;;  %v931_v2 = vld [vmem:[%s1401_s1 + $0x10] sm:$0xff]   ;;  %v932_v3 = vld [vmem:[%s1401_s1 + $0x18] sm:$0xff]   ;;  %v1208_v4 = vld [vmem:[%s1189_s28] sm:$0xff]  ;;  %s676_s13 = sshll.u32 %s1317_s11, 4  ;;  %s1350_s12 = scalar_lea.hbm %s1405_s5, %s782_s25  ;;  %s1352_s13 = int_to_ptr.vmem [resolvable:$true] %s676_s13 }
  0x3a   : > { %816 = vmatpush3.bf16.msra.mxu0 %v929_v0  ;;  %v1211_v5 = vld [vmem:[%s1189_s28 + $0x8] sm:$0xff]  ;;  %v933_v7 = vld [vmem:[%s1401_s1 + $0x20] sm:$0xff]   ;;  %v939_v11 = vld [vmem:[%s1403_s3 + $0x10] sm:$0xff]   ;;  %s663_s22 = scalar_lea.sflag [#allocation4], %s1183_s23  ;;  %s975_s14 = scalar_lea.vmem %s1352_s13, 2048 }
  0x3b   : > { %817 = vmatprep.subr.bf16.mxu0 %v930_v1  ;;  %v262_v6 = vpack.c.bf16 %v1211_v5, %v1208_v4  ;;  %v937_v8 = vld [vmem:[%s1403_s3] sm:$0xff]   ;;  %v938_v9 = vld [vmem:[%s1403_s3 + $0x8] sm:$0xff]   ;;  %v935_v12 = vld [vmem:[%s1401_s1 + $0x30] sm:$0xff]   ;;  %p976_p6 = scmp.ne.s32.totalorder %s1352_s13, %s975_s14  ;;  %p1412_p11 = scmp.ne.s32.totalorder %s1409_s30, 0 }
  0x3c   : > { %v934_v10 = vld [vmem:[%s1401_s1 + $0x28] sm:$0xff]   ;;  %847 = vmatprep.subr.bf16.mxu1 %v937_v8  ;;  %v940_v13 = vld [vmem:[%s1403_s3 + $0x18] sm:$0xff]   ;;  %v941_v15 = vld [vmem:[%s1403_s3 + $0x20] sm:$0xff]   ;;  %s1046_s15 = smov [#allocation5]  }
  0x3d   : > { %831 = vmatprep.mubr.bf16.mxu0 %v262_v6  ;;  %848 = vmatpush3.bf16.msra.mxu1 %v937_v8  ;;  %v936_v14 = vld [vmem:[%s1401_s1 + $0x38] sm:$0xff]   ;;  %v1243_v16 = vld [vmem:[%s1189_s28 + $0x10] sm:$0xff]  ;;  %v1249_v18 = vld [vmem:[%s1189_s28 + $0x20] sm:$0xff]  ;;  %p977_p12 = pnand %p976_p6, %p1412_p11  ;;  %s979_s16 = sshll.u32 %s1046_s15, 4  ;;  %s980_s16 = int_to_ptr.vmem [resolvable:$false] %s979_s16 }
  0x3e   : > { %818 = vmatpush3.bf16.msra.mxu0 %v930_v1  ;;  %849 = vmatprep.subr.bf16.mxu1 %v938_v9  ;;  %v1246_v17 = vld [vmem:[%s1189_s28 + $0x18] sm:$0xff]  ;;  %v1252_v19 = vld [vmem:[%s1189_s28 + $0x28] sm:$0xff]  ;;  %v1262_v23 = vld [vmem:[%s1189_s28 + $0x30] sm:$0xff]  ;;  %s981_s8 = scalar_lea.vmem %s980_s16, 4096  ;;  %p982_p8 = scmp.lt.s32.totalorder %s1352_s13, %s980_s16 }
  0x3f   : > { %819 = vmatprep.subr.bf16.mxu0 %v931_v2  ;;  %v263_v20 = vpack.c.bf16 %v1246_v17, %v1243_v16  ;;  %v942_v21 = vld [vmem:[%s1403_s3 + $0x28] sm:$0xff]   ;;  %v264_v22 = vpack.c.bf16 %v1252_v19, %v1249_v18  ;;  %v1265_v24 = vld [vmem:[%s1189_s28 + $0x38] sm:$0xff]  ;;  %v1268_v25 = vld [vmem:[%s1189_s28 + $0x40] sm:$0xff]  ;;  %p978_p13 = pneg %p977_p12  ;;  %p983_p10 = scmp.lt.s32.totalorder %s981_s8, %s975_s14 }
  0x40   : > { %v1271_v26 = vld [vmem:[%s1189_s28 + $0x48] sm:$0xff]  ;;  %v265_v27 = vpack.c.bf16 %v1265_v24, %v1262_v23  ;;  %v1278_v29 = vld [vmem:[%s1189_s28 + $0x50] sm:$0xff]  ;;  %v1281_v30 = vld [vmem:[%s1189_s28 + $0x58] sm:$0xff] }
  0x41   : > { %850 = vmatpush3.bf16.msra.mxu1 %v938_v9  ;;  %v266_v28 = vpack.c.bf16 %v1271_v26, %v1268_v25  ;;  %v1284_v31 = vld [vmem:[%s1189_s28 + $0x60] sm:$0xff]  ;;  %v1287_v32 = vld [vmem:[%s1189_s28 + $0x68] sm:$0xff]  ;;  %v267_v33 = vpack.c.bf16 %v1281_v30, %v1278_v29  ;;  %v1294_v35 = vld [vmem:[%s1189_s28 + $0x70] sm:$0xff]  ;;  %p984_p0 = por %p983_p10, %p982_p8 }
  0x42   : > { %820 = vmatpush3.bf16.msra.mxu0 %v931_v2  ;;  %851 = vmatprep.subr.bf16.mxu1 %v939_v11  ;;  %v268_v34 = vpack.c.bf16 %v1287_v32, %v1284_v31  ;;  %v1297_v36 = vld [vmem:[%s1189_s28 + $0x78] sm:$0xff]  ;;  %v943_v38 = vld [vmem:[%s1403_s3 + $0x30] sm:$0xff]   ;;  %v758_v40 = vld [vmem:[%s1402_s2] ss:$0 sm:$0xff] }
  0x43   : > { %821 = vmatprep.subr.bf16.mxu0 %v932_v3  ;;  %v269_v37 = vpack.c.bf16 %v1297_v36, %v1294_v35  ;;  %v944_v39 = vld [vmem:[%s1403_s3 + $0x38] sm:$0xff]   ;;  %p985_p2 = pnand %p984_p0, %p978_p13 }
  0x45   : > { %852 = vmatpush3.bf16.msra.mxu1 %v939_v11 }
  0x46   : > { %822 = vmatpush3.bf16.msra.mxu0 %v932_v3  ;;  %853 = vmatprep.subr.bf16.mxu1 %v940_v13 }
  0x47   : > { %823 = vmatprep.subr.bf16.mxu0 %v933_v7 }
  0x49   : > { %854 = vmatpush3.bf16.msra.mxu1 %v940_v13 }
  0x4a   : > { %824 = vmatpush3.bf16.msra.mxu0 %v933_v7  ;;  %855 = vmatprep.subr.bf16.mxu1 %v941_v15 }
  0x4b   : > { %825 = vmatprep.subr.bf16.mxu0 %v934_v10 }
  0x4d   : > { %856 = vmatpush3.bf16.msra.mxu1 %v941_v15 }
  0x4e   : > { %826 = vmatpush3.bf16.msra.mxu0 %v934_v10  ;;  %857 = vmatprep.subr.bf16.mxu1 %v942_v21 }
  0x4f   : > { %827 = vmatprep.subr.bf16.mxu0 %v935_v12 }
  0x51   : > { %858 = vmatpush3.bf16.msra.mxu1 %v942_v21 }
  0x52   : > { %828 = vmatpush3.bf16.msra.mxu0 %v935_v12  ;;  %859 = vmatprep.subr.bf16.mxu1 %v943_v38 }
  0x53   : > { %829 = vmatprep.subr.bf16.mxu0 %v936_v14 }
  0x55   : > { %860 = vmatpush3.bf16.msra.mxu1 %v943_v38 }
  0x56   : > { %830 = vmatpush3.bf16.msra.mxu0 %v936_v14  ;;  %861 = vmatprep.subr.bf16.mxu1 %v944_v39 }
  0x59   : > { %832 = vmatmul.mubr.bf16.vlgmr.msra.gmra.mrb[0].mxu0 %v263_v20  ;;  %862 = vmatpush3.bf16.msra.mxu1 %v944_v39 }
  0x5a   : > { %835 = vmatprep.mubr.bf16.mxu0 %v264_v22 }
  0x61   : > { %836 = vmatmul.mubr.bf16.gmra.mrb[4].mxu0 %v265_v27 }
  0x62   : > { %839 = vmatprep.mubr.bf16.mxu0 %v266_v28 }
  0x69   : > { %840 = vmatmul.mubr.bf16.gmra.mrb[8].mxu0 %v267_v33 }
  0x6a   : > { %843 = vmatprep.mubr.bf16.mxu0 %v268_v34 }
  0x71   : > { %844 = vmatmul.mubr.bf16.gmra.mrb[12].mxu0 %v269_v37 }
 0x12c   : > { %v833_v41 = vpop.f32.mrb[0].mxu0 }
 0x12d   : > { %v384_v42 = vadd.f32 %v833_v41, %v758_v40  ;;  %v375_v43 = vpop.f32.mrb[1].mxu0 }
 0x12e   : > { %v376_v44 = vadd.f32 %v758_v40, %v375_v43  ;;  %v834_v45 = vpop.f32.mrb[2].mxu0 }
 0x12f   : > { %v387_v46 = vadd.f32 %v834_v45, %v758_v40  ;;  %v378_v47 = vpop.f32.mrb[3].mxu0  ;;  %v440_v49 = vmax.f32 %v384_v42, 0.0 }
 0x130   : > { %v379_v48 = vadd.f32 %v758_v40, %v378_v47  ;;  %v438_v51 = vmax.f32 %v376_v44, 0.0 }
 0x131   : > { %v441_v50 = vmax.f32 %v387_v46, 0.0 }
 0x132   : > { %v439_v52 = vmax.f32 %v379_v48, 0.0 }
 0x133   : > { %v455_v53 = vpack.c.bf16 %v441_v50, %v440_v49  ;;  %v767_v50 = vld [vmem:[%s1404_s4] ss:$0 sm:$0xff] }
 0x134   : > { %v837_v54 = vpop.f32.mrb[4].mxu0  ;;  %v454_v55 = vpack.c.bf16 %v439_v52, %v438_v51 }
 0x135   : > { %v400_v56 = vadd.f32 %v837_v54, %v758_v40  ;;  %v391_v57 = vpop.f32.mrb[5].mxu0 }
 0x136   : > { %v392_v58 = vadd.f32 %v758_v40, %v391_v57  ;;  %v838_v59 = vpop.f32.mrb[6].mxu0  ;;  %863 = vmatprep.mubr.bf16.mxu1 %v454_v55 }
 0x137   : > { %v403_v60 = vadd.f32 %v838_v59, %v758_v40  ;;  %v394_v61 = vpop.f32.mrb[7].mxu0  ;;  %864 = vmatmul.mubr.bf16.vlgmr.msra.gmra.mrb[0].mxu1 %v455_v53  ;;  %v444_v63 = vmax.f32 %v400_v56, 0.0 }
 0x138   : > { %v395_v62 = vadd.f32 %v758_v40, %v394_v61  ;;  %v442_v1 = vmax.f32 %v392_v58, 0.0 }
 0x139   : > { %v445_v0 = vmax.f32 %v403_v60, 0.0 }
 0x13a   : > { %v443_v2 = vmax.f32 %v395_v62, 0.0 }
 0x13b   : > { %v457_v3 = vpack.c.bf16 %v445_v0, %v444_v63 }
 0x13c   : > { %v456_v6 = vpack.c.bf16 %v443_v2, %v442_v1  ;;  %v841_v7 = vpop.f32.mrb[8].mxu0 }
 0x13d   : > { %v416_v8 = vadd.f32 %v841_v7, %v758_v40  ;;  %v407_v9 = vpop.f32.mrb[9].mxu0 }
 0x13e   : > { %v408_v10 = vadd.f32 %v758_v40, %v407_v9  ;;  %v842_v11 = vpop.f32.mrb[10].mxu0  ;;  %867 = vmatprep.mubr.bf16.mxu1 %v456_v6 }
 0x13f   : > { %v419_v12 = vadd.f32 %v842_v11, %v758_v40  ;;  %v410_v13 = vpop.f32.mrb[11].mxu0  ;;  %868 = vmatmul.mubr.bf16.gmra.mrb[4].mxu1 %v457_v3  ;;  %v448_v15 = vmax.f32 %v416_v8, 0.0 }
 0x140   : > { %v411_v14 = vadd.f32 %v758_v40, %v410_v13  ;;  %v446_v21 = vmax.f32 %v408_v10, 0.0 }
 0x141   : > { %v449_v20 = vmax.f32 %v419_v12, 0.0 }
 0x142   : > { %v447_v22 = vmax.f32 %v411_v14, 0.0 }
 0x143   : > { %v459_v27 = vpack.c.bf16 %v449_v20, %v448_v15 }
 0x144   : > { %v458_v28 = vpack.c.bf16 %v447_v22, %v446_v21  ;;  %v845_v33 = vpop.f32.mrb[12].mxu0 }
 0x145   : > { %v432_v34 = vadd.f32 %v845_v33, %v758_v40  ;;  %v423_v37 = vpop.f32.mrb[13].mxu0 }
 0x146   : > { %v424_v38 = vadd.f32 %v758_v40, %v423_v37  ;;  %v846_v39 = vpop.f32.mrb[14].mxu0  ;;  %871 = vmatprep.mubr.bf16.mxu1 %v458_v28 }
 0x147   : > { %v435_v41 = vadd.f32 %v846_v39, %v758_v40  ;;  %v426_v42 = vpop.f32.mrb[15].mxu0  ;;  %872 = vmatmul.mubr.bf16.gmra.mrb[8].mxu1 %v459_v27  ;;  %v452_v44 = vmax.f32 %v432_v34, 0.0 }
 0x148   : > { %v427_v43 = vadd.f32 %v758_v40, %v426_v42  ;;  %v450_v46 = vmax.f32 %v424_v38, 0.0 }
 0x149   : > { %v453_v45 = vmax.f32 %v435_v41, 0.0 }
 0x14a   : > { %v451_v47 = vmax.f32 %v427_v43, 0.0 }
 0x14b   : > { %v461_v48 = vpack.c.bf16 %v453_v45, %v452_v44 }
 0x14c   : > { %v460_v49 = vpack.c.bf16 %v451_v47, %v450_v46 }
 0x14e   : > { %875 = vmatprep.mubr.bf16.mxu1 %v460_v49 }
 0x14f   : > { %876 = vmatmul.mubr.bf16.gmra.mrb[12].mxu1 %v461_v48 }
 0x20a   : > { %v865_v51 = vpop.f32.mrb[0].mxu1 }
 0x20b   : > { %v576_v52 = vadd.f32 %v865_v51, %v767_v50  ;;  %v567_v53 = vpop.f32.mrb[1].mxu1 }
 0x20c   : > { %v568_v54 = vadd.f32 %v767_v50, %v567_v53  ;;  %v866_v55 = vpop.f32.mrb[2].mxu1 }
 0x20d   : > { %v632_v40 = vadd.f32 %v576_v52, %v1243_v16  ;;  %v579_v56 = vadd.f32 %v866_v55, %v767_v50  ;;  %v570_v57 = vpop.f32.mrb[3].mxu1 }
 0x20e   : > { %v630_v58 = vadd.f32 %v568_v54, %v1208_v4  ;;  %v571_v59 = vadd.f32 %v767_v50, %v570_v57 }
 0x20f   : > { %648 = vst [vmem:[%s1317_s11 + $0x10] sm:$0xff] %v632_v40  ;;  %v633_v60 = vadd.f32 %v579_v56, %v1246_v17 }
 0x210   : > { %646 = vst [vmem:[%s1317_s11] sm:$0xff] %v630_v58  ;;  %v631_v16 = vadd.f32 %v571_v59, %v1211_v5 }
 0x211   : > { %649 = vst [vmem:[%s1317_s11 + $0x18] sm:$0xff] %v633_v60 }
 0x212   : > { %647 = vst [vmem:[%s1317_s11 + $0x8] sm:$0xff] %v631_v16  ;;  %v869_v4 = vpop.f32.mrb[4].mxu1 }
 0x213   : > { %v592_v61 = vadd.f32 %v869_v4, %v767_v50  ;;  %v583_v62 = vpop.f32.mrb[5].mxu1 }
 0x214   : > { %v584_v63 = vadd.f32 %v767_v50, %v583_v62  ;;  %v870_v0 = vpop.f32.mrb[6].mxu1 }
 0x215   : > { %v636_v1 = vadd.f32 %v592_v61, %v1262_v23  ;;  %v595_v2 = vadd.f32 %v870_v0, %v767_v50  ;;  %v586_v3 = vpop.f32.mrb[7].mxu1 }
 0x216   : > { %v634_v6 = vadd.f32 %v584_v63, %v1249_v18  ;;  %v587_v17 = vadd.f32 %v767_v50, %v586_v3 }
 0x217   : > { %652 = vst [vmem:[%s1317_s11 + $0x30] sm:$0xff] %v636_v1  ;;  %v637_v5 = vadd.f32 %v595_v2, %v1265_v24 }
 0x218   : > { %650 = vst [vmem:[%s1317_s11 + $0x20] sm:$0xff] %v634_v6  ;;  %v635_v7 = vadd.f32 %v587_v17, %v1252_v19 }
 0x219   : > { %653 = vst [vmem:[%s1317_s11 + $0x38] sm:$0xff] %v637_v5 }
 0x21a   : > { %651 = vst [vmem:[%s1317_s11 + $0x28] sm:$0xff] %v635_v7  ;;  %v873_v8 = vpop.f32.mrb[8].mxu1 }
 0x21b   : > { %v608_v9 = vadd.f32 %v873_v8, %v767_v50  ;;  %v599_v23 = vpop.f32.mrb[9].mxu1 }
 0x21c   : > { %v600_v10 = vadd.f32 %v767_v50, %v599_v23  ;;  %v874_v11 = vpop.f32.mrb[10].mxu1 }
 0x21d   : > { %v640_v18 = vadd.f32 %v608_v9, %v1278_v29  ;;  %v611_v12 = vadd.f32 %v874_v11, %v767_v50  ;;  %v602_v13 = vpop.f32.mrb[11].mxu1 }
 0x21e   : > { %v638_v24 = vadd.f32 %v600_v10, %v1268_v25  ;;  %v603_v14 = vadd.f32 %v767_v50, %v602_v13 }
 0x21f   : > { %656 = vst [vmem:[%s1317_s11 + $0x50] sm:$0xff] %v640_v18  ;;  %v641_v19 = vadd.f32 %v611_v12, %v1281_v30 }
 0x220   : > { %654 = vst [vmem:[%s1317_s11 + $0x40] sm:$0xff] %v638_v24  ;;  %v639_v15 = vadd.f32 %v603_v14, %v1271_v26 }
 0x221   : > { %657 = vst [vmem:[%s1317_s11 + $0x58] sm:$0xff] %v641_v19 }
 0x222   : > { %655 = vst [vmem:[%s1317_s11 + $0x48] sm:$0xff] %v639_v15  ;;  %v877_v20 = vpop.f32.mrb[12].mxu1 }
 0x223   : > { %v624_v21 = vadd.f32 %v877_v20, %v767_v50  ;;  %v615_v29 = vpop.f32.mrb[13].mxu1 }
 0x224   : > { %v616_v22 = vadd.f32 %v767_v50, %v615_v29  ;;  %v878_v27 = vpop.f32.mrb[14].mxu1 }
 0x225   : > { %v644_v25 = vadd.f32 %v624_v21, %v1294_v35  ;;  %v627_v30 = vadd.f32 %v878_v27, %v767_v50  ;;  %v618_v28 = vpop.f32.mrb[15].mxu1 }
 0x226   : > { %v642_v26 = vadd.f32 %v616_v22, %v1284_v31  ;;  %v619_v33 = vadd.f32 %v767_v50, %v618_v28 }
 0x227   : > { %660 = vst [vmem:[%s1317_s11 + $0x70] sm:$0xff] %v644_v25  ;;  %v645_v34 = vadd.f32 %v627_v30, %v1297_v36 }
 0x228   : > { %658 = vst [vmem:[%s1317_s11 + $0x60] sm:$0xff] %v642_v26  ;;  %v643_v35 = vadd.f32 %v619_v33, %v1287_v32 }
 0x229   : > { %661 = vst [vmem:[%s1317_s11 + $0x78] sm:$0xff] %v645_v34 }
 0x22a   : > { %659 = vst [vmem:[%s1317_s11 + $0x68] sm:$0xff] %v643_v35 }
 0x22b   : > { %988 = shalt.err (!%p985_p2)
}
 0x22c   : > { %s989_s7 = scalar_lea.hbm %s1350_s12, 2048  ;;  %s993_s28 = scalar_lea.hbm %s1405_s5, 4096 }
 0x22d   : > { %p990_p4 = scmp.ne.s32.totalorder %s1350_s12, %s989_s7  ;;  %p994_p9 = scmp.lt.u32.totalorder %s1350_s12, %s1405_s5 }
 0x22e   : > { %p995_p1 = scmp.lt.u32.totalorder %s993_s28, %s989_s7  ;;  %p997_p6 = scmp.lt.u32.totalorder %s989_s7, %s1350_s12 }
 0x22f   : > { %p991_p5 = pnand %p990_p4, %p1412_p11 }
 0x230   : > { %p996_p3 = por %p995_p1, %p994_p9 }
 0x231   : > { %p992_p7 = pneg %p991_p5 }
 0x232   : > { %p998_p12 = por %p997_p6, %p996_p3 }
 0x234   : > { %p999_p13 = pnand %p998_p12, %p992_p7 }
 0x236   : > { %1002 = shalt.err (!%p999_p13)
}
 0x237   : > { %s1047_s25 = smov 128   ;;  %s1048_s17 = smov 8  }
 0x238   : > { %881 = dma.vmem_to_hbm [thread:$0]  (%p1412_p11), %s1352_s13, 2048, %s1350_s12, %s663_s22, %s1047_s25, %s1047_s25, %s1048_s17  }
 0x239 PF: > { %s691_s26 = sand.u32 1, %s1029_s18   ;;  %p1413_p8 = scmp.ne.s32.totalorder %s1410_s6, 0 }
 0x23a   : > { %p1414_p10 = scmp.ge.s32.totalorder %s1041_s21, 2  ;;  %s692_s14 = scalar_lea.sflag [#allocation4], %s691_s26 }
 0x23c   : > { %p888_p0 = pnand %p1414_p10, %p1413_p8 }
 0x23e   : > { %1024 = dma.done.wait (!%p888_p0), %s692_s14, 2048  }
 0x23f   : > { %1026 = vsyncadd (!%p888_p0), %s692_s14, 4294965248  ;;  %p18_p2 = scmp.ge.s32.totalorder %s1104_s24, 4   ;;  %s1415_s18 = smov %s1033_s19 }
 0x240   : > { %s1416_s19 = smov %s1037_s20  ;;  %s1417_s20 = smov %s1116_s27 }
 0x241   : > { %s1418_s21 = smov %s1104_s24  ;;  %20 = sbr.rel (!%p18_p2) target bundleno = 5 (0x5), region = 85 }
 0x248   :  { %697 = vsyncpa [#allocation3], 1 }
 0x249   :  { %699 = vsyncpa [#allocation3 + $0x1], 1 }
 0x24a   :  { %700 = vsyncpa [#allocation4], 1 }
 0x24b   :  { %702 = vsyncpa [#allocation4 + $0x1], 1 }

</bundles_post_ra>
